<compile_context>
chip_gen: v5e
topology: v5e:2x2
jax: 0.10.0
libtpu: 0.0.40
codegen_flags: <defaults>
</compile_context>

<pallas_src>
import jax
import jax.numpy as jnp
from jax.experimental import pallas as pl
from jax.experimental.pallas import tpu as pltpu


def _round_up(x, m):
    return ((x + m - 1) // m) * m


# ----------------------------------------------------------------------------
# Fused kernel:  c_f = c_mean @ w_dec + y   (MXU)
#                out = alpha * c_f + beta   (folded conv1+conv2, VPU epilogue)
# ----------------------------------------------------------------------------
def fused_head_kernel(ab_ref, cmean_ref, wdec_ref, ybias_ref, o_ref):
    alpha = ab_ref[0, 0]                      # folded conv gain   (SMEM scalar)
    beta = ab_ref[0, 1]                       # folded conv offset (SMEM scalar)
    c_f = jnp.dot(cmean_ref[...], wdec_ref[...],
                  preferred_element_type=jnp.float32) + ybias_ref[...]
    o_ref[...] = alpha * c_f + beta


def fused_conv_head(c_mean, w_dec, y, conv1_w, conv1_b, conv2_w, conv2_b,
                    *, force_pallas=False):
    """c_mean: (B, T), w_dec: (T, N), y: (B, N)  ->  y_pred: (B, N, 1) f32.

    Computes conv2(conv1((c_mean @ w_dec + y).unsqueeze/permute)) for the two
    1x1 Conv1d layers of the reference Model, using the exact algebraic fold.
    """
    B, T = c_mean.shape
    N = w_dec.shape[1]
    f32 = jnp.float32

    # Fold the two 1x1 convs into a single scalar affine (exact for k=1 convs).
    alpha = jnp.sum(conv1_w.astype(f32) * conv2_w.astype(f32))
    beta = (jnp.sum(conv2_w.astype(f32) * conv1_b.astype(f32))
            + conv2_b.astype(f32).reshape(()))

    # Small-problem fallback: pallas_call fixed overhead dominates below ~32K
    # output elements; a single XLA fusion is strictly faster there.
    if not force_pallas and B * N < 32768:
        c_f = c_mean.astype(f32) @ w_dec.astype(f32) + y.astype(f32)
        return (alpha * c_f + beta)[:, :, None]

    ab = jnp.stack([alpha, beta]).reshape(1, 2).astype(f32)

    # Tile selection: full dim when it fits under the cap (always legal), else a
    # hardware-aligned cap with ragged edge blocks handled by Pallas masking.
    BM_CAP, BN_CAP = 512, 1024                # caps keep 2x-buffered blocks <16 MiB (v5e)
    bm = B if B <= BM_CAP else BM_CAP         # sublane tile (rows)
    bn = N if N <= BN_CAP else BN_CAP         # lane tile (cols)

    # v7x: make sure the "parallel" grid has >=2 blocks so both TCs engage.
    if pl.cdiv(B, bm) * pl.cdiv(N, bn) < 2:
        if N >= 256:
            bn = _round_up(pl.cdiv(N, 2), 128)
        elif B >= 16:
            bm = _round_up(pl.cdiv(B, 2), 8)

    gb = pl.cdiv(B, bm)
    gn = pl.cdiv(N, bn)

    cost = pl.CostEstimate(
        flops=2 * B * T * N + 2 * B * N,
        transcendentals=0,
        bytes_accessed=4 * (B * T + T * N + 2 * B * N),
    )

    # Grid order: j (N axis) slow, i (B axis) fast -> the w_dec column tile is
    # DMA'd once per j instead of once per (i, j).
    out = pl.pallas_call(
        fused_head_kernel,
        out_shape=jax.ShapeDtypeStruct((B, N), f32),
        grid=(gn, gb),
        in_specs=[
            pl.BlockSpec(memory_space=pltpu.MemorySpace.SMEM),      # alpha/beta
            pl.BlockSpec((bm, T), lambda j, i: (i, 0)),             # c_mean tile
            pl.BlockSpec((T, bn), lambda j, i: (0, j)),             # w_dec tile
            pl.BlockSpec((bm, bn), lambda j, i: (i, j)),            # y bias tile
        ],
        out_specs=pl.BlockSpec((bm, bn), lambda j, i: (i, j)),
        compiler_params=pltpu.CompilerParams(
            dimension_semantics=("parallel", "parallel")),
        cost_estimate=cost,
    )(ab, c_mean.astype(f32), w_dec.astype(f32), y.astype(f32))

    # permute(0, 2, 1) of the (B, 1, N) conv output -> (B, N, 1).  The trailing
    # `.squeeze(2)` in the reference is not assigned, so shape stays (B, N, 1).
    return out[:, :, None]


# ----------------------------------------------------------------------------
# Deterministic stand-ins for the undefined Encoder / Decoder.
# ----------------------------------------------------------------------------
def encoder_standin(x_miss, m, w_enc):
    # TODO(synk): Encoder class is not defined in the reference source; this is
    # a deterministic stand-in (masked linear projection C -> E + tanh).
    return jnp.tanh((x_miss * m) @ w_enc)                        # (B, T, E)


def decoder_standin(x_miss, y, c, m, delta):
    # TODO(synk): Decoder class is not defined in the reference source; this is
    # a deterministic stand-in producing (x_B, x_F, x_pred) of x_miss's shape
    # and the context features feeding c_f.
    x_B = x_miss * m
    x_F = x_miss * m + (1.0 - m) * delta
    x_pred = 0.5 * (x_B + x_F)
    c_mean = jnp.mean(c, axis=-1)                                # (B, T)
    return x_B, x_F, x_pred, c_mean


# ----------------------------------------------------------------------------
# Full model forward (stand-in glue in JAX, fused c_f + conv head in Pallas).
# ----------------------------------------------------------------------------
def model_forward(params, x_miss, y, m, delta, *, force_pallas=False):
    c = encoder_standin(x_miss, m, params["w_enc"])
    x_B, x_F, x_pred, c_mean = decoder_standin(x_miss, y, c, m, delta)
    y_pred = fused_conv_head(c_mean, params["w_dec"], y,
                             params["conv1_w"], params["conv1_b"],
                             params["conv2_w"], params["conv2_b"],
                             force_pallas=force_pallas)
    return x_B, x_F, x_pred, y_pred


def init_params(key, C, T, out_T_dim, embed_size):
    k1, k2, k3, k4, k5, k6 = jax.random.split(key, 6)
    return {
        # stand-in encoder / decoder projections
        "w_enc": jax.random.normal(k1, (C, embed_size), jnp.float32) * 0.1,
        "w_dec": jax.random.normal(k2, (T, out_T_dim), jnp.float32) * 0.1,
        # nn.Conv1d(1, embed_size, 1): weight (E, 1, 1), bias (E,) -> rows
        "conv1_w": jax.random.normal(k3, (1, embed_size), jnp.float32) * 0.1,
        "conv1_b": jax.random.normal(k4, (1, embed_size), jnp.float32) * 0.1,
        # nn.Conv1d(embed_size, 1, 1): weight (1, E, 1), bias (1,) -> rows
        "conv2_w": jax.random.normal(k5, (1, embed_size), jnp.float32) * 0.1,
        "conv2_b": jax.random.normal(k6, (1, 1), jnp.float32) * 0.1,
    }


if __name__ == "__main__":
    # small shapes consistent with the module
    B, C, T, out_T_dim, embed_size = 2, 4, 8, 8, 32

    key = jax.random.PRNGKey(0)
    kp, kx, ky, km, kd = jax.random.split(key, 5)

    params = init_params(kp, C, T, out_T_dim, embed_size)

    x_miss = jax.random.normal(kx, (B, T, C), jnp.float32)
    y = jax.random.normal(ky, (B, out_T_dim), jnp.float32)
    m = (jax.random.uniform(km, (B, T, C)) > 0.3).astype(jnp.float32)
    delta = jax.random.uniform(kd, (B, T, C), jnp.float32)

    # force_pallas=True so the Pallas kernel itself is exercised at demo shapes
    # (the production path would use the small-problem fallback here).
    x_B, x_F, x_pred, y_pred = model_forward(params, x_miss, y, m, delta,
                                             force_pallas=True)
    jax.block_until_ready((x_B, x_F, x_pred, y_pred))

    # sanity: plain-JAX reference of the (unfolded, unfused) conv head
    c = encoder_standin(x_miss, m, params["w_enc"])
    _, _, _, c_mean = decoder_standin(x_miss, y, c, m, delta)
    c_f = c_mean @ params["w_dec"] + y
    h_ref = c_f[:, :, None] * params["conv1_w"][None] + params["conv1_b"][None]
    y_ref = (jnp.sum(h_ref * params["conv2_w"][None], axis=-1)
             + params["conv2_b"])[:, :, None]

    assert y_pred.shape == (B, out_T_dim, 1)
    assert jnp.allclose(y_pred, y_ref, atol=1e-3, rtol=1e-3)

    # also exercise the small-problem fallback path for parity
    _, _, _, y_pred_fb = model_forward(params, x_miss, y, m, delta)
    jax.block_until_ready(y_pred_fb)
    assert jnp.allclose(y_pred_fb, y_ref, atol=1e-3, rtol=1e-3)

    print("KERNEL_OK")
</pallas_src>

<mosaic_0001>
module attributes {stable_mosaic.version = 11 : i64} {
  func.func @fused_head_kernel(%arg0: i32, %arg1: i32, %arg2: memref<1x2xf32, #tpu.memory_space<smem>>, %arg3: memref<2x8xf32, #tpu.memory_space<vmem>>, %arg4: memref<8x8xf32, #tpu.memory_space<vmem>>, %arg5: memref<2x8xf32, #tpu.memory_space<vmem>>, %arg6: memref<2x8xf32, #tpu.memory_space<vmem>>) attributes {dimension_semantics = [#tpu.dimension_semantics<parallel>, #tpu.dimension_semantics<parallel>], iteration_bounds = array<i64: 1, 1>, scalar_prefetch = 0 : i64, scratch_operands = 0 : i64, tpu.core_type = #tpu.core_type<tc>, window_params = [{transform_indices = @transform_0, window_bounds = array<i64: 1, 2>}, {transform_indices = @transform_1, window_bounds = array<i64: 2, 8>}, {transform_indices = @transform_2, window_bounds = array<i64: 8, 8>}, {transform_indices = @transform_3, window_bounds = array<i64: 2, 8>}, {transform_indices = @transform_4, window_bounds = array<i64: 2, 8>}]} {
    %c0 = arith.constant 0 : index
    %c0_0 = arith.constant 0 : index
    %0 = memref.load %arg2[%c0, %c0_0] : memref<1x2xf32, #tpu.memory_space<smem>>
    %c0_1 = arith.constant 0 : index
    %c1 = arith.constant 1 : index
    %1 = memref.load %arg2[%c0_1, %c1] : memref<1x2xf32, #tpu.memory_space<smem>>
    %c0_2 = arith.constant 0 : index
    %c0_3 = arith.constant 0 : index
    %2 = vector.load %arg3[%c0_2, %c0_3] : memref<2x8xf32, #tpu.memory_space<vmem>>, vector<2x8xf32>
    %c0_4 = arith.constant 0 : index
    %c0_5 = arith.constant 0 : index
    %3 = vector.load %arg4[%c0_4, %c0_5] : memref<8x8xf32, #tpu.memory_space<vmem>>, vector<8x8xf32>
    %cst = arith.constant dense<0.000000e+00> : vector<2x8xf32>
    %4 = tpu.matmul %2, %3, %cst {dimension_numbers = #tpu.dot_dimension_numbers<[1], [0], [0], [1], [0, 0, 1, 1], [], []>} : vector<2x8xf32>, vector<8x8xf32>, vector<2x8xf32> -> vector<2x8xf32>
    %c0_6 = arith.constant 0 : index
    %c0_7 = arith.constant 0 : index
    %5 = vector.load %arg5[%c0_6, %c0_7] : memref<2x8xf32, #tpu.memory_space<vmem>>, vector<2x8xf32>
    %6 = arith.addf %4, %5 : vector<2x8xf32>
    %7 = vector.broadcast %0 : f32 to vector<2x8xf32>
    %8 = arith.mulf %7, %6 : vector<2x8xf32>
    %9 = vector.broadcast %1 : f32 to vector<2x8xf32>
    %10 = arith.addf %8, %9 : vector<2x8xf32>
    %c0_8 = arith.constant 0 : index
    %c0_9 = arith.constant 0 : index
    %11 = vector.load %arg6[%c0_8, %c0_9] : memref<2x8xf32, #tpu.memory_space<vmem>>, vector<2x8xf32>
    tpu.vector_store %arg6[%c0_8, %c0_9], %10 {strides = array<i32>} : memref<2x8xf32, #tpu.memory_space<vmem>>, vector<2x8xf32>,
    return
  }
  func.func @transform_0(%arg0: i32, %arg1: i32) -> (i32, i32) {
    %c0_i32 = arith.constant 0 : i32
    %c0_i32_0 = arith.constant 0 : i32
    %c0_i32_1 = arith.constant 0 : i32
    return %c0_i32, %c0_i32_0 : i32, i32
  }
  func.func @transform_1(%arg0: i32, %arg1: i32) -> (i32, i32) {
    %c0_i32 = arith.constant 0 : i32
    %c0_i32_0 = arith.constant 0 : i32
    return %arg1, %c0_i32 : i32, i32
  }
  func.func @transform_2(%arg0: i32, %arg1: i32) -> (i32, i32) {
    %c0_i32 = arith.constant 0 : i32
    %c0_i32_0 = arith.constant 0 : i32
    return %c0_i32, %arg0 : i32, i32
  }
  func.func @transform_3(%arg0: i32, %arg1: i32) -> (i32, i32) {
    %c0_i32 = arith.constant 0 : i32
    return %arg1, %arg0 : i32, i32
  }
  func.func @transform_4(%arg0: i32, %arg1: i32) -> (i32, i32) {
    %c0_i32 = arith.constant 0 : i32
    return %arg1, %arg0 : i32, i32
  }
}

</mosaic_0001>

<bundles_post_ra>
// kernel: tpu_custom_call.1
= control target key start
LH: loop header
LB: loop body
LE: loop exit
PB: predicated region body
PF: predicated region fallthrough
CT: control target
= control target key end

     0   :  { %9 = vsyncpa [#allocation5], 0  ;;  %s255_s0 = inlined_call_operand.hbm [shape: f32[1,2], index: 0, kind: input, shape index: {}]   ;;  %s256_s1 = inlined_call_operand.hbm [shape: f32[2,8], index: 1, kind: input, shape index: {}]   ;;  %s257_s2 = inlined_call_operand.hbm [shape: f32[8,8], index: 2, kind: input, shape index: {}]   ;;  %s258_s3 = inlined_call_operand.vmem [shape: f32[2,8], index: 3, kind: input, shape index: {}]   ;;  %s259_s4 = inlined_call_operand.hbm [shape: f32[2,8], index: 4, kind: output, shape index: {}]  }
   0x1   :  { %10 = vsyncpa [#allocation3], 0 }
   0x2   :  { %11 = vsyncpa [#allocation8], 0 }
   0x3   :  { %12 = vsyncpa [#allocation4], 0  ;;  %s18_s17 = sshll.u32 %s255_s0, 4  ;;  %s27_s20 = sshll.u32 %s256_s1, 4  ;;  %s19_s17 = int_to_ptr.hbm [resolvable:$true] %s18_s17  ;;  %s28_s20 = int_to_ptr.hbm [resolvable:$true] %s27_s20 }
   0x4   :  { %s211_s21 = smov [#allocation2]   ;;  %s212_s22 = smov [#allocation6]  }
   0x5   :  { %21 = dma.hbm_to_smem %s19_s17, 16, %s211_s21, [#allocation5]  }
   0x6   :  { %s29_s23 = sshll.u32 %s212_s22, 4  ;;  %s38_s26 = sshll.u32 %s257_s2, 4  ;;  %s30_s23 = int_to_ptr.vmem [resolvable:$true] %s29_s23  ;;  %s39_s26 = int_to_ptr.hbm [resolvable:$true] %s38_s26 }
   0x7   :  { %32 = dma.hbm_to_vmem [thread:$0]  %s28_s20, 32, %s30_s23, [#allocation3]  }
   0x8   :  { %s213_s27 = smov [#allocation7]  }
   0x9   :  { %s40_s28 = sshll.u32 %s213_s27, 4  ;;  %s41_s28 = int_to_ptr.vmem [resolvable:$true] %s40_s28 }
   0xa   :  { %43 = dma.hbm_to_vmem [thread:$0]  %s39_s26, 128, %s41_s28, [#allocation8]  }
   0xb   :  { %203 = dma.done.wait [#allocation5], 16  }
   0xc   :  { %204 = vsyncadd [#allocation5], 4294967280 }
   0xd   :  { %205 = dma.done.wait [#allocation3], 32  }
   0xe   :  { %206 = vsyncadd [#allocation3], 4294967264 }
   0xf   :  { %207 = dma.done.wait [#allocation8], 128  }
  0x10   :  { %208 = vsyncadd [#allocation8], 4294967168 }
  0x11   :  { %58 = sfence }
  0x12   :  { %v62_v0 = vld [vmem:[#allocation7] sm:$0xff]  ;;  %v61_v1 = vld [vmem:[#allocation6] sm:$0x3]  ;;  %vm64_vm0 = vcmask 64512   ;;  %s59_s0 = sld [smem:[#allocation2]]  ;;  %s214_s30 = smov [#allocation9]  }
  0x13   :  { %83 = vmatpush.msra.mxu0 %v62_v0  ;;  %s113_s1 = sld [smem:[#allocation2 + $0x1]]  ;;  %v63_v2 = vld [vmem:[%s258_s3] sm:$0x3]  ;;  %s99_s5 = sshll.u32 %s214_s30, 4  ;;  %vm92_vm1 = vcmask 58368   ;;  %s100_s5 = int_to_ptr.vmem [resolvable:$true] %s99_s5 }
  0x14   :  { %114 = vmatmul.msk.f32.vlgmr.msra.gmra.mxu0 %vm64_vm0, %v61_v1  ;;  %s101_s8 = sshll.u32 %s259_s4, 4  ;;  %s102_s8 = int_to_ptr.hbm [resolvable:$true] %s101_s8 }
  0x18   :  { %v88_v4 = vstv %s59_s0 }
  0x19   :  { %v90_v6 = vstv %s113_s1 }
  0x91   :  { %v85_v3 = vpop.f32.mrf.mxu0 }
  0x92   :  { %v86_v5 = vadd.f32 %v85_v3, %v63_v2 }
  0x94   :  { %v89_v7 = vmul.f32 %v88_v4, %v86_v5 }
  0x96   :  { %v91_v8 = vadd.f32 %v90_v6, %v89_v7 }
  0x98   :  { %93 = vst.msk [vmem:[#allocation9] sm:$0x3] %vm92_vm1, %v91_v8 }
  0x99   :  { %104 = dma.vmem_to_hbm [thread:$0]  %s100_s5, 32, %s102_s8, [#allocation4]  }
  0x9a   :  { %209 = dma.done.wait [#allocation4], 32  }
  0x9b   :  { %210 = vsyncadd [#allocation4], 4294967264 }
  0x9c   :  { %109 = vsyncpa [#allocation3], 1 }
  0x9d   :  { %110 = vsyncpa [#allocation8], 1 }
  0x9e   :  { %111 = vsyncpa [#allocation4], 1 }
  0x9f   :  { %112 = vsyncpa [#allocation5], 1 }

</bundles_post_ra>
